<compile_context>
chip_gen: v6e
topology: v6e:2x2x1
jax: 0.10.0
libtpu: 0.0.40
codegen_flags: <defaults>
</compile_context>

<pallas_src>
import jax
import jax.numpy as jnp
from jax.experimental import pallas as pl
from jax.experimental.pallas import tpu as pltpu

_LANE = 1024     # lane-dense width, multiple of 128
_TR_MAX = 512    # max rows per tile (multiple of 8); 512*1024*4B = 2 MiB f32


def _tanh_kernel(x_ref, o_ref):
    # Compute in f32 (valid on v5e which lacks bf16 VPU/EUP), store in the
    # original dtype. Same semantics as 2/(1+exp(-2x)) - 1.
    x = x_ref[...].astype(jnp.float32)
    o_ref[...] = jnp.tanh(x).astype(o_ref.dtype)


def tanh_pallas(x):
    """Elementwise tanh on an array of any shape (NCHW in the reference)."""
    orig_shape = x.shape
    orig_dtype = x.dtype
    total = x.size
    if total == 0:
        return x

    flat = x.reshape(-1)

    # Pad the flat length so it reshapes into (R, _LANE) lane-dense rows.
    lane_pad = (-total) % _LANE
    if lane_pad:
        flat = jnp.pad(flat, (0, lane_pad))
    rows = flat.shape[0] // _LANE

    if rows <= _TR_MAX:
        # Small tensor: one block covering all rows (block == array dims, so
        # the (8,128) divisibility rule is satisfied trivially).
        tile_rows = rows
    else:
        tile_rows = _TR_MAX
        row_pad = (-rows) % tile_rows
        if row_pad:
            flat = jnp.pad(flat, (0, row_pad * _LANE))
            rows += row_pad

    x2 = flat.reshape(rows, _LANE)
    grid = (rows // tile_rows,)

    out = pl.pallas_call(
        _tanh_kernel,
        out_shape=jax.ShapeDtypeStruct((rows, _LANE), orig_dtype),
        grid_spec=pl.GridSpec(
            grid=grid,
            in_specs=[pl.BlockSpec((tile_rows, _LANE), lambda i: (i, 0))],
            out_specs=pl.BlockSpec((tile_rows, _LANE), lambda i: (i, 0)),
        ),
        compiler_params=pltpu.CompilerParams(
            dimension_semantics=("parallel",),
        ),
    )(x2)

    return out.reshape(-1)[:total].reshape(orig_shape)


if __name__ == "__main__":
    key = jax.random.PRNGKey(0)
    # NCHW input, small shapes: batch=2, channels=4, spatial=16x16
    x = jax.random.normal(key, (2, 4, 16, 16), dtype=jnp.float32)

    y = tanh_pallas(x)
    y = jax.block_until_ready(y)

    # Sanity check against jnp.tanh (same math as 2/(1+exp(-2x)) - 1)
    ref = jnp.tanh(x)
    assert y.shape == x.shape and y.dtype == x.dtype
    assert jnp.max(jnp.abs(y - ref)) < 1e-5

    print("KERNEL_OK")
</pallas_src>

<mosaic_0001>
module attributes {stable_mosaic.version = 11 : i64} {
  func.func @_tanh_kernel(%arg0: i32, %arg1: memref<2x1024xf32, #tpu.memory_space<vmem>>, %arg2: memref<2x1024xf32, #tpu.memory_space<vmem>>) attributes {dimension_semantics = [#tpu.dimension_semantics<parallel>], iteration_bounds = array<i64: 1>, scalar_prefetch = 0 : i64, scratch_operands = 0 : i64, tpu.core_type = #tpu.core_type<tc>, window_params = [{transform_indices = @transform_0, window_bounds = array<i64: 2, 1024>}, {transform_indices = @transform_1, window_bounds = array<i64: 2, 1024>}]} {
    %c0 = arith.constant 0 : index
    %c0_0 = arith.constant 0 : index
    %0 = vector.load %arg1[%c0, %c0_0] : memref<2x1024xf32, #tpu.memory_space<vmem>>, vector<2x1024xf32>
    %1 = math.tanh %0 : vector<2x1024xf32>
    %c0_1 = arith.constant 0 : index
    %c0_2 = arith.constant 0 : index
    %2 = vector.load %arg2[%c0_1, %c0_2] : memref<2x1024xf32, #tpu.memory_space<vmem>>, vector<2x1024xf32>
    tpu.vector_store %arg2[%c0_1, %c0_2], %1 {strides = array<i32>} : memref<2x1024xf32, #tpu.memory_space<vmem>>, vector<2x1024xf32>,
    return
  }
  func.func @transform_0(%arg0: i32) -> (i32, i32) {
    %c0_i32 = arith.constant 0 : i32
    %c0_i32_0 = arith.constant 0 : i32
    return %arg0, %c0_i32 : i32, i32
  }
  func.func @transform_1(%arg0: i32) -> (i32, i32) {
    %c0_i32 = arith.constant 0 : i32
    %c0_i32_0 = arith.constant 0 : i32
    return %arg0, %c0_i32 : i32, i32
  }
}

</mosaic_0001>

<bundles_post_ra>
// kernel: tpu_custom_call.1
= control target key start
LH: loop header
LB: loop body
LE: loop exit
PB: predicated region body
PF: predicated region fallthrough
CT: control target
= control target key end

     0   :  { %6 = vsyncpa [#allocation3], 0  ;;  %s110_s0 = inlined_call_operand.hbm [shape: f32[2,1024], index: 0, kind: input, shape index: {}]   ;;  %s111_s1 = inlined_call_operand.hbm [shape: f32[2,1024], index: 1, kind: output, shape index: {}]  }
   0x1   :  { %7 = vsyncpa [#allocation4], 0  ;;  %s92_s6 = smov [#allocation2]  }
   0x2   :  { %s14_s7 = sshll.u32 %s92_s6, 4  ;;  %s15_s7 = int_to_ptr.vmem [resolvable:$true] %s14_s7 }
   0x3   :  { %s56_s8 = scalar_lea.vmem %s15_s7, 256  ;;  %p61_p1 = scmp.lt.s32.totalorder %s15_s7, %s15_s7 }
   0x4   :  { %p57_p0 = scmp.ne.s32.totalorder %s15_s7, %s56_s8  ;;  %p62_p2 = scmp.lt.s32.totalorder %s56_s8, %s56_s8 }
   0x6   :  { %p63_p3 = por %p62_p2, %p61_p1 }
   0x8   :  { %p64_p4 = pnand %p63_p3, %p57_p0 }
   0xa   :  { %67 = shalt.err (!%p64_p4)
}
   0xb   :  { %17 = dma.hbm_to_vmem [thread:$0]  %s110_s0, 256, %s15_s7, [#allocation3]  }
   0xc   :  { %88 = dma.done.wait [#allocation3], 256  }
   0xd   :  { %89 = vsyncadd [#allocation3], 4294967040  ;;  %v21_v0 = vld [vmem:[#allocation2] sm:$0xff]  ;;  %v22_v1 = vld [vmem:[#allocation2 + $0x8] sm:$0xff]  ;;  %s93_s11 = smov [#allocation5]  }
   0xe   :  { %44 = vtanh.f32 %v21_v0  ;;  %s33_s12 = sshll.u32 %s93_s11, 4  ;;  %s34_s12 = int_to_ptr.vmem [resolvable:$true] %s33_s12 }
   0xf   :  { %46 = vtanh.f32 %v22_v1  ;;  %s68_s13 = scalar_lea.vmem %s34_s12, 256  ;;  %p73_p6 = scmp.lt.s32.totalorder %s34_s12, %s34_s12 }
  0x10   :  { %p69_p5 = scmp.ne.s32.totalorder %s34_s12, %s68_s13  ;;  %p74_p7 = scmp.lt.s32.totalorder %s68_s13, %s68_s13 }
  0x12   :  { %p75_p8 = por %p74_p7, %p73_p6 }
  0x14   :  { %p76_p9 = pnand %p75_p8, %p69_p5 }
  0x1b   :  { %v45_v2 = vpop.eup %44 }
  0x1c   :  { %v47_v3 = vpop.eup %46  ;;  %25 = vst [vmem:[#allocation5] sm:$0xff] %v45_v2 }
  0x1d   :  { %26 = vst [vmem:[#allocation5 + $0x8] sm:$0xff] %v47_v3 }
  0x1e   :  { %79 = shalt.err (!%p76_p9)
}
  0x1f   :  { %36 = dma.vmem_to_hbm [thread:$0]  %s34_s12, 256, %s111_s1, [#allocation4]  }
  0x20   :  { %90 = dma.done.wait [#allocation4], 256  }
  0x21   :  { %91 = vsyncadd [#allocation4], 4294967040 }
  0x22   :  { %40 = vsyncpa [#allocation3], 1 }
  0x23   :  { %41 = vsyncpa [#allocation4], 1 }

</bundles_post_ra>
